<compile_context>
chip_gen: v7x
topology: tpu7x:2x2x1
jax: 0.10.0
libtpu: 0.0.40
codegen_flags: <defaults>
</compile_context>

<pallas_src>
import functools

import jax
import jax.numpy as jnp
from jax import lax
from jax.experimental import pallas as pl
from jax.experimental.pallas import tpu as pltpu

LN_EPS = 1e-5


def _round_up(x, m):
    return (x + m - 1) // m * m


def _vmem_capacity_bytes():
    try:
        return int(pltpu.get_tpu_info().vmem_capacity_bytes)
    except Exception:  # conservative fallback (v7x-sized)
        return 64 << 20


def _choose_row_tiling(rows, max_tm):
    """Pick (rows_padded, row_tile) with row_tile | rows_padded and row_tile % 8 == 0.

    Keeps row padding small (<=7 rows for small inputs, <=127 otherwise) and,
    when there is enough work, yields >=2 grid steps so the parallel row axis
    can be split across v7x's two TensorCores.
    """
    max_tm = max(128, _round_up(max_tm, 128))
    if rows <= max_tm:
        if rows >= 256:
            rows_p = _round_up(rows, 16)
            return rows_p, rows_p // 2          # 2 steps -> both v7x TCs busy
        rows_p = _round_up(rows, 8)
        return rows_p, rows_p                   # single small tile
    rows_p = _round_up(rows, 128)               # padding bounded by 127 rows
    k = rows_p // 128
    limit = max(1, min(max_tm // 128, k // 2))  # force >=2 steps when possible
    best = 1
    for m in range(1, limit + 1):
        if k % m == 0:
            best = m
    return rows_p, 128 * best


def prenorm_kernel(x_ref, g_ref, b_ref, w_ref, wb_ref, o_ref, *, d_real, precision):
    # x_ref: (tm, Dp) row tile; g/b: (1, Dp) f32; w: (Dp, tn); wb: (1, tn) f32.
    x = x_ref[...].astype(jnp.float32)

    # One-pass LayerNorm statistics. Padded feature lanes are zero, so both
    # sums are exact without any iota/mask work; only inv_d uses the real D.
    inv_d = jnp.float32(1.0 / d_real)
    mean = jnp.sum(x, axis=-1, keepdims=True) * inv_d
    mean_sq = jnp.sum(x * x, axis=-1, keepdims=True) * inv_d
    var = jnp.maximum(mean_sq - mean * mean, 0.0)
    xn = (x - mean) * lax.rsqrt(var + LN_EPS)

    # gamma/beta are zero-padded, so padded lanes of y are exactly zero.
    y = xn * g_ref[...] + b_ref[...]

    # fn = Linear(dim, dim): feed the MXU in W's native (bf16) dtype, f32 acc.
    out = jnp.dot(y.astype(w_ref.dtype), w_ref[...],
                  preferred_element_type=jnp.float32, precision=precision)
    o_ref[...] = (out + wb_ref[...]).astype(o_ref.dtype)


def prepare_prenorm_params(gamma, beta, w, wb, *, use_bf16_mxu=True):
    """One-time padding/casting of the LayerNorm + Linear params (hoisted out
    of the per-call forward so stacked CRATE blocks don't re-pad W each call)."""
    D = w.shape[0]
    Dp = _round_up(D, 128)
    pad = Dp - D
    w_dtype = jnp.bfloat16 if (use_bf16_mxu and w.dtype == jnp.float32) else w.dtype
    g2 = jnp.pad(gamma.astype(jnp.float32), (0, pad)).reshape(1, Dp)
    b2 = jnp.pad(beta.astype(jnp.float32), (0, pad)).reshape(1, Dp)
    wb2 = jnp.pad(wb.astype(jnp.float32), (0, pad)).reshape(1, Dp)
    w2 = jnp.pad(w.astype(w_dtype), ((0, pad), (0, pad)))
    return g2, b2, w2, wb2


@functools.partial(jax.jit, static_argnames=("max_block_rows",))
def prenorm_forward(x, g2, b2, w2, wb2, *, max_block_rows=512):
    B, N, D = x.shape
    Dp = g2.shape[-1]
    rows = B * N

    x_item = x.dtype.itemsize
    w_item = w2.dtype.itemsize
    vmem_cap = _vmem_capacity_bytes()

    # Shrink the row tile when Dp is large so the in-kernel f32 intermediates
    # ((tm, Dp) tiles) stay well inside VMEM, especially on v7x (64 MiB).
    max_tm = min(max_block_rows, max(128, (4 << 20) // (Dp * 4)))
    rows_p, tm = _choose_row_tiling(rows, max_tm)

    # Column-tile W only when a fully resident W would eat too much VMEM.
    if Dp * Dp * w_item <= vmem_cap // 4:
        tn = Dp
    else:
        tn = 512 if Dp % 512 == 0 else (256 if Dp % 256 == 0 else 128)

    # Grid-invariant weight: single-buffer it when its tile is big.
    single_buffer_w = Dp * tn * w_item >= (4 << 20)
    n_w_buf = 1 if single_buffer_w else 2
    w_spec_kwargs = {}
    if single_buffer_w:
        w_spec_kwargs["pipeline_mode"] = pl.Buffered(buffer_count=1)

    x2 = x.reshape(rows, D)
    needs_pad = (rows_p != rows) or (Dp != D)
    if needs_pad:
        x2 = jnp.pad(x2, ((0, rows_p - rows), (0, Dp - D)))

    grid = (rows_p // tm, Dp // tn)

    # VMEM budget: pipeline buffers + resident params + in-kernel f32 temps,
    # capped at ~85% of the physical VMEM of whatever chip we are on.
    est = (2 * tm * Dp * x_item             # double-buffered x tiles
           + 2 * tm * tn * x_item           # double-buffered out tiles
           + n_w_buf * Dp * tn * w_item     # weight tile(s)
           + 2 * (2 * Dp + tn) * 4          # gamma / beta / wb
           + 6 * tm * Dp * 4                # f32 intermediates (x, xn, y, ...)
           + 2 * tm * tn * 4)               # f32 matmul result
    vmem_limit = int(min(max(est + (4 << 20), 32 << 20), int(vmem_cap * 0.85)))

    # bf16 weights -> native MXU; f32 weights -> exact (multi-pass) matmul.
    precision = None if w2.dtype != jnp.float32 else lax.Precision.HIGHEST

    out = pl.pallas_call(
        functools.partial(prenorm_kernel, d_real=D, precision=precision),
        out_shape=jax.ShapeDtypeStruct((rows_p, Dp), x.dtype),
        grid_spec=pltpu.PrefetchScalarGridSpec(
            num_scalar_prefetch=0,
            grid=grid,
            in_specs=[
                pl.BlockSpec((tm, Dp), lambda i, j: (i, 0)),   # x rows (streamed)
                pl.BlockSpec((1, Dp), lambda i, j: (0, 0)),    # gamma (resident)
                pl.BlockSpec((1, Dp), lambda i, j: (0, 0)),    # beta  (resident)
                pl.BlockSpec((Dp, tn), lambda i, j: (0, j),    # W column tile
                             **w_spec_kwargs),
                pl.BlockSpec((1, tn), lambda i, j: (0, j)),    # Linear bias tile
            ],
            out_specs=pl.BlockSpec((tm, tn), lambda i, j: (i, j)),
        ),
        compiler_params=pltpu.CompilerParams(
            dimension_semantics=("parallel", "parallel"),
            vmem_limit_bytes=vmem_limit),
    )(x2, g2, b2, w2, wb2)

    if needs_pad:
        out = out[:rows, :D]
    return out.reshape(B, N, D)


def reference_forward(x, gamma, beta, w, wb):
    xf = x.astype(jnp.float32)
    mean = jnp.mean(xf, axis=-1, keepdims=True)
    var = jnp.mean((xf - mean) ** 2, axis=-1, keepdims=True)
    y = (xf - mean) / jnp.sqrt(var + LN_EPS) * gamma + beta
    return (y @ w + wb).astype(x.dtype)


if __name__ == "__main__":
    key = jax.random.PRNGKey(0)
    B, N, D = 2, 8, 32  # batch=2, seq=8, hidden dim=32

    kx, kw, kb = jax.random.split(key, 3)
    x = jax.random.normal(kx, (B, N, D), dtype=jnp.float32)

    # LayerNorm params: PyTorch default init (ones / zeros).
    gamma = jnp.ones((D,), dtype=jnp.float32)
    beta = jnp.zeros((D,), dtype=jnp.float32)

    # fn = Linear(dim, dim), PyTorch-default-style uniform init.
    bound = 1.0 / float(D) ** 0.5
    w = jax.random.uniform(kw, (D, D), minval=-bound, maxval=bound,
                           dtype=jnp.float32)
    wb = jax.random.uniform(kb, (D,), minval=-bound, maxval=bound,
                            dtype=jnp.float32)

    # One-time parameter prep (padding + bf16 cast for the MXU).
    g2, b2, w2, wb2 = prepare_prenorm_params(gamma, beta, w, wb)

    out = prenorm_forward(x, g2, b2, w2, wb2)
    out = jax.block_until_ready(out)
    assert out.shape == (B, N, D)
    assert bool(jnp.all(jnp.isfinite(out)))

    ref = reference_forward(x, gamma, beta, w, wb)
    # bf16 MXU inputs with f32 accumulation -> bf16-level tolerance vs f32 ref.
    assert jnp.allclose(out, ref, atol=3e-2, rtol=3e-2), "mismatch vs reference"

    print("KERNEL_OK")
</pallas_src>

<mosaic_0001>
module attributes {stable_mosaic.version = 11 : i64} {
  func.func @prenorm_kernel(%arg0: i32, %arg1: i32, %arg2: memref<16x128xf32, #tpu.memory_space<vmem>>, %arg3: memref<1x128xf32, #tpu.memory_space<vmem>>, %arg4: memref<1x128xf32, #tpu.memory_space<vmem>>, %arg5: memref<128x128xbf16, #tpu.memory_space<vmem>>, %arg6: memref<1x128xf32, #tpu.memory_space<vmem>>, %arg7: memref<16x128xf32, #tpu.memory_space<vmem>>) attributes {dimension_semantics = [#tpu.dimension_semantics<parallel>, #tpu.dimension_semantics<parallel>], iteration_bounds = array<i64: 1, 1>, scalar_prefetch = 0 : i64, scratch_operands = 0 : i64, tpu.core_type = #tpu.core_type<tc>, window_params = [{transform_indices = @transform_0, window_bounds = array<i64: 16, 128>}, {pipeline_mode = #tpu.pipeline_mode<synchronous>, transform_indices = @transform_1, window_bounds = array<i64: 1, 128>}, {pipeline_mode = #tpu.pipeline_mode<synchronous>, transform_indices = @transform_2, window_bounds = array<i64: 1, 128>}, {transform_indices = @transform_3, window_bounds = array<i64: 128, 128>}, {transform_indices = @transform_4, window_bounds = array<i64: 1, 128>}, {transform_indices = @transform_5, window_bounds = array<i64: 16, 128>}]} {
    %c0 = arith.constant 0 : index
    %c0_0 = arith.constant 0 : index
    %0 = vector.load %arg2[%c0, %c0_0] : memref<16x128xf32, #tpu.memory_space<vmem>>, vector<16x128xf32>
    %cst = arith.constant dense<0.000000e+00> : vector<16xf32>
    %1 = vector.multi_reduction <add>, %0, %cst [1] : vector<16x128xf32> to vector<16xf32>
    %2 = vector.shape_cast %1 : vector<16xf32> to vector<16x1xf32>
    %cst_1 = arith.constant 3.125000e-02 : f32
    %3 = vector.broadcast %cst_1 : f32 to vector<16x1xf32>
    %4 = arith.mulf %2, %3 : vector<16x1xf32>
    %5 = arith.mulf %0, %0 : vector<16x128xf32>
    %cst_2 = arith.constant dense<0.000000e+00> : vector<16xf32>
    %6 = vector.multi_reduction <add>, %5, %cst_2 [1] : vector<16x128xf32> to vector<16xf32>
    %7 = vector.shape_cast %6 : vector<16xf32> to vector<16x1xf32>
    %cst_3 = arith.constant 3.125000e-02 : f32
    %8 = vector.broadcast %cst_3 : f32 to vector<16x1xf32>
    %9 = arith.mulf %7, %8 : vector<16x1xf32>
    %10 = arith.mulf %4, %4 : vector<16x1xf32>
    %11 = arith.subf %9, %10 : vector<16x1xf32>
    %cst_4 = arith.constant 0.000000e+00 : f32
    %12 = vector.broadcast %cst_4 : f32 to vector<16x1xf32>
    %13 = arith.maximumf %11, %12 : vector<16x1xf32>
    %14 = vector.broadcast %4 : vector<16x1xf32> to vector<16x128xf32>
    %15 = arith.subf %0, %14 : vector<16x128xf32>
    %cst_5 = arith.constant 9.99999974E-6 : f32
    %16 = vector.broadcast %cst_5 : f32 to vector<16x1xf32>
    %17 = arith.addf %13, %16 : vector<16x1xf32>
    %18 = math.rsqrt %17 : vector<16x1xf32>
    %19 = vector.broadcast %18 : vector<16x1xf32> to vector<16x128xf32>
    %20 = arith.mulf %15, %19 : vector<16x128xf32>
    %c0_6 = arith.constant 0 : index
    %c0_7 = arith.constant 0 : index
    %21 = vector.load %arg3[%c0_6, %c0_7] : memref<1x128xf32, #tpu.memory_space<vmem>>, vector<1x128xf32>
    %22 = vector.broadcast %21 : vector<1x128xf32> to vector<16x128xf32>
    %23 = arith.mulf %20, %22 : vector<16x128xf32>
    %c0_8 = arith.constant 0 : index
    %c0_9 = arith.constant 0 : index
    %24 = vector.load %arg4[%c0_8, %c0_9] : memref<1x128xf32, #tpu.memory_space<vmem>>, vector<1x128xf32>
    %25 = vector.broadcast %24 : vector<1x128xf32> to vector<16x128xf32>
    %26 = arith.addf %23, %25 : vector<16x128xf32>
    %27 = arith.truncf %26 : vector<16x128xf32> to vector<16x128xbf16>
    %c0_10 = arith.constant 0 : index
    %c0_11 = arith.constant 0 : index
    %28 = vector.load %arg5[%c0_10, %c0_11] : memref<128x128xbf16, #tpu.memory_space<vmem>>, vector<128x128xbf16>
    %cst_12 = arith.constant dense<0.000000e+00> : vector<16x128xf32>
    %29 = tpu.matmul %27, %28, %cst_12 {dimension_numbers = #tpu.dot_dimension_numbers<[1], [0], [0], [1], [0, 0, 1, 1], [], []>} : vector<16x128xbf16>, vector<128x128xbf16>, vector<16x128xf32> -> vector<16x128xf32>
    %c0_13 = arith.constant 0 : index
    %c0_14 = arith.constant 0 : index
    %30 = vector.load %arg6[%c0_13, %c0_14] : memref<1x128xf32, #tpu.memory_space<vmem>>, vector<1x128xf32>
    %31 = vector.broadcast %30 : vector<1x128xf32> to vector<16x128xf32>
    %32 = arith.addf %29, %31 : vector<16x128xf32>
    %c0_15 = arith.constant 0 : index
    %c0_16 = arith.constant 0 : index
    %33 = vector.load %arg7[%c0_15, %c0_16] : memref<16x128xf32, #tpu.memory_space<vmem>>, vector<16x128xf32>
    tpu.vector_store %arg7[%c0_15, %c0_16], %32 {strides = array<i32>} : memref<16x128xf32, #tpu.memory_space<vmem>>, vector<16x128xf32>,
    return
  }
  func.func @transform_0(%arg0: i32, %arg1: i32) -> (i32, i32) {
    %c0_i32 = arith.constant 0 : i32
    %c0_i32_0 = arith.constant 0 : i32
    return %arg0, %c0_i32 : i32, i32
  }
  func.func @transform_1(%arg0: i32, %arg1: i32) -> (i32, i32) {
    %c0_i32 = arith.constant 0 : i32
    %c0_i32_0 = arith.constant 0 : i32
    %c0_i32_1 = arith.constant 0 : i32
    return %c0_i32, %c0_i32_0 : i32, i32
  }
  func.func @transform_2(%arg0: i32, %arg1: i32) -> (i32, i32) {
    %c0_i32 = arith.constant 0 : i32
    %c0_i32_0 = arith.constant 0 : i32
    %c0_i32_1 = arith.constant 0 : i32
    return %c0_i32, %c0_i32_0 : i32, i32
  }
  func.func @transform_3(%arg0: i32, %arg1: i32) -> (i32, i32) {
    %c0_i32 = arith.constant 0 : i32
    %c0_i32_0 = arith.constant 0 : i32
    return %c0_i32, %arg1 : i32, i32
  }
  func.func @transform_4(%arg0: i32, %arg1: i32) -> (i32, i32) {
    %c0_i32 = arith.constant 0 : i32
    %c0_i32_0 = arith.constant 0 : i32
    return %c0_i32, %arg1 : i32, i32
  }
  func.func @transform_5(%arg0: i32, %arg1: i32) -> (i32, i32) {
    %c0_i32 = arith.constant 0 : i32
    return %arg0, %arg1 : i32, i32
  }
}

</mosaic_0001>

<bundles_post_ra>
// kernel: prenorm_forward.1
= control target key start
LH: loop header
LB: loop body
LE: loop exit
PB: predicated region body
PF: predicated region fallthrough
CT: control target
= control target key end

     0   :  { %10 = vsyncpa [#allocation3], 0  ;;  %s284_s18 = smov [#allocation2]   ;;  %s352_s0 = inlined_call_operand.vmem [shape: f32[16,128], index: 0, kind: input, shape index: {}]   ;;  %s353_s1 = inlined_call_operand.vmem [shape: f32[1,128], index: 1, kind: input, shape index: {}]   ;;  %s354_s2 = inlined_call_operand.vmem [shape: f32[1,128], index: 2, kind: input, shape index: {}]   ;;  %s355_s3 = inlined_call_operand.hbm [shape: bf16[128,128], index: 3, kind: input, shape index: {}]   ;;  %s356_s4 = inlined_call_operand.vmem [shape: f32[1,128], index: 4, kind: input, shape index: {}]   ;;  %s357_s5 = inlined_call_operand.vmem [shape: f32[16,128], index: 5, kind: output, shape index: {}]  }
   0x1   :  { %s22_s19 = sshll.u32 %s284_s18, 4  ;;  %s260_s22 = scalar_lea.hbm %s355_s3, 1024  ;;  %s23_s19 = int_to_ptr.vmem [resolvable:$true] %s22_s19 }
   0x2   :  { %p261_p0 = scmp.ne.s32.totalorder %s355_s3, %s260_s22  ;;  %p264_p1 = scmp.lt.u32.totalorder %s260_s22, %s355_s3 }
   0x4   :  { %p266_p2 = pnand %p264_p1, %p261_p0 }
   0x6   :  { %269 = shalt.err (!%p266_p2)
}
   0x7   :  { %s270_s27 = scalar_lea.vmem %s23_s19, 1024  ;;  %p275_p4 = scmp.lt.s32.totalorder %s23_s19, %s23_s19 }
   0x8   :  { %p271_p3 = scmp.ne.s32.totalorder %s23_s19, %s270_s27  ;;  %p276_p5 = scmp.lt.s32.totalorder %s270_s27, %s270_s27 }
   0xa   :  { %p277_p6 = por %p276_p5, %p275_p4 }
   0xc   :  { %p278_p7 = pnand %p277_p6, %p271_p3 }
   0xe   :  { %281 = shalt.err (!%p278_p7)
}
   0xf   :  { %s285_s28 = smov 64   ;;  %s286_s29 = smov 4  }
  0x10   :  { %28 = dma.hbm_to_vmem [thread:$0]  %s355_s3, 1024, %s23_s19, [#allocation3], %s285_s28, %s285_s28, %s286_s29  }
  0x11   :  { %282 = dma.done.wait [#allocation3], 1024  }
  0x12   :  { %283 = vsyncadd [#allocation3], 4294966272  ;;  %v35_v0 = vld [vmem:[%s352_s0] sm:$0xff]  ;;  %v36_v1 = vld [vmem:[%s352_s0 + $0x8] sm:$0xff]  ;;  %v287_v5 = vmov 0.0   ;;  %vm288_vm0 = vmmov 0  }
  0x13   :  { %37 = vadd.xlane.f32.xlu0 %v35_v0  ;;  %v43_v2 = vmul.f32 %v35_v0, %v35_v0  ;;  %v44_v3 = vmul.f32 %v36_v1, %v36_v1  ;;  %v248_v4 = vld [vmem:[#allocation2] sm:$0xff]   ;;  %223 = vmatprep.subr.bf16.mxu0 %v287_v5  ;;  %v249_v6 = vld [vmem:[#allocation2 + $0x8] sm:$0xff]   ;;  %v250_v7 = vld [vmem:[#allocation2 + $0x10] sm:$0xff]  }
  0x14   :  { %224 = vmatpush3.bf16.msra.mxu0 %v248_v4  ;;  %v251_v8 = vld [vmem:[#allocation2 + $0x18] sm:$0xff]   ;;  %v252_v9 = vld [vmem:[#allocation2 + $0x20] sm:$0xff]   ;;  %239 = vmatprep.mubr.msk.bf16.mxu0 %vm288_vm0, %v287_v5  ;;  %v253_v10 = vld [vmem:[#allocation2 + $0x28] sm:$0xff]  }
  0x15   :  { %45 = vadd.xlane.f32.xlu1 %v43_v2  ;;  %225 = vmatprep.subr.bf16.mxu0 %v287_v5  ;;  %v254_v11 = vld [vmem:[#allocation2 + $0x30] sm:$0xff]   ;;  %v255_v12 = vld [vmem:[#allocation2 + $0x38] sm:$0xff]   ;;  %v203_v32 = vld [vmem:[%s353_s1] ss:$0 sm:$0xff] }
  0x16   :  { %v204_v37 = vld [vmem:[%s354_s2] ss:$0 sm:$0xff] }
  0x17   :  { %39 = vadd.xlane.f32.xlu0 %v36_v1  ;;  %v205_v42 = vld [vmem:[%s356_s4] ss:$0 sm:$0xff] }
  0x18   :  { %226 = vmatpush3.bf16.msra.mxu0 %v249_v6 }
  0x19   :  { %47 = vadd.xlane.f32.xlu1 %v44_v3  ;;  %227 = vmatprep.subr.bf16.mxu0 %v287_v5 }
  0x1c   :  { %228 = vmatpush3.bf16.msra.mxu0 %v250_v7 }
  0x1d   :  { %229 = vmatprep.subr.bf16.mxu0 %v287_v5 }
  0x20   :  { %230 = vmatpush3.bf16.msra.mxu0 %v251_v8 }
  0x21   :  { %231 = vmatprep.subr.bf16.mxu0 %v287_v5 }
  0x24   :  { %232 = vmatpush3.bf16.msra.mxu0 %v252_v9 }
  0x25   :  { %233 = vmatprep.subr.bf16.mxu0 %v287_v5 }
  0x28   :  { %234 = vmatpush3.bf16.msra.mxu0 %v253_v10 }
  0x29   :  { %235 = vmatprep.subr.bf16.mxu0 %v287_v5 }
  0x2c   :  { %236 = vmatpush3.bf16.msra.mxu0 %v254_v11 }
  0x2d   :  { %237 = vmatprep.subr.bf16.mxu0 %v287_v5 }
  0x30   :  { %238 = vmatpush3.bf16.msra.mxu0 %v255_v12 }
  0xa0   :  { %v38_v13 = vpop.xlane.xlu0 %37 }
  0xa1   :  { %v41_v14 = vmul.f32 0.03125, %v38_v13 }
  0xa2   :  { %v46_v15 = vpop.xlane.xlu1 %45 }
  0xa3   :  { %v51_v16 = vmul.f32 %v41_v14, %v41_v14  ;;  %v49_v17 = vmul.f32 0.03125, %v46_v15  ;;  %v57_v29 = vsub.f32 %v35_v0, %v41_v14 }
  0xa4   :  { %v40_v18 = vpop.xlane.xlu0 %39 }
  0xa5   :  { %v53_v19 = vsub.f32 %v49_v17, %v51_v16  ;;  %v42_v20 = vmul.f32 0.03125, %v40_v18 }
  0xa6   :  { %v48_v21 = vpop.xlane.xlu1 %47 }
  0xa7   :  { %v55_v22 = vmax.f32 %v53_v19, 0.0  ;;  %v52_v23 = vmul.f32 %v42_v20, %v42_v20  ;;  %v50_v24 = vmul.f32 0.03125, %v48_v21  ;;  %v58_v33 = vsub.f32 %v36_v1, %v42_v20 }
  0xa9   :  { %v59_v25 = vadd.f32 1e-05, %v55_v22  ;;  %v54_v26 = vsub.f32 %v50_v24, %v52_v23 }
  0xab   :  { %256 = vrsqrt.f32 %v59_v25  ;;  %v56_v27 = vmax.f32 %v54_v26, 0.0 }
  0xad   :  { %v60_v28 = vadd.f32 1e-05, %v56_v27 }
  0xaf   :  { %258 = vrsqrt.f32 %v60_v28 }
  0xb5   :  { %v257_v30 = vpop.eup %256 }
  0xb6   :  { %v63_v31 = vmul.f32 %v257_v30, %v57_v29 }
  0xb8   :  { %v72_v36 = vmul.f32 %v203_v32, %v63_v31 }
  0xb9   :  { %v259_v34 = vpop.eup %258 }
  0xba   :  { %v64_v35 = vmul.f32 %v259_v34, %v58_v33  ;;  %v81_v39 = vadd.f32 %v204_v37, %v72_v36 }
  0xbc   :  { %v73_v38 = vmul.f32 %v203_v32, %v64_v35 }
  0xbe   :  { %v82_v40 = vadd.f32 %v204_v37, %v73_v38 }
  0xc0   :  { %v83_v41 = vpack.c.bf16 %v82_v40, %v81_v39 }
  0xc2   :  { %240 = vmatmul.mubr.bf16.vlgmr.msra.gmra.mrb[0].mxu0 %v83_v41 }
 0x195   :  { %v189_v43 = vpop.f32.mrb[0].mxu0 }
 0x196   :  { %v190_v44 = vadd.f32 %v205_v42, %v189_v43  ;;  %v241_v45 = vpop.f32.mrb[1].mxu0 }
 0x197   :  { %v192_v46 = vpop.f32.mrb[2].mxu0 }
 0x198   :  { %196 = vst [vmem:[%s357_s5] sm:$0xff] %v190_v44  ;;  %v193_v47 = vadd.f32 %v205_v42, %v192_v46  ;;  %v242_v48 = vpop.f32.mrb[3].mxu0 }
 0x19a   :  { %197 = vst [vmem:[%s357_s5 + $0x8] sm:$0xff] %v193_v47 }
 0x19b   :  { %202 = vsyncpa [#allocation3], 1 }

</bundles_post_ra>
